<compile_context>
chip_gen: v5e
topology: v5e:2x2
jax: 0.10.0
libtpu: 0.0.40
codegen_flags: <defaults>
</compile_context>

<pallas_src>
import jax
import jax.numpy as jnp
from jax.experimental import pallas as pl
from jax.experimental.pallas import tpu as pltpu

STATE_SIZE = 4
ACTION_SIZE = 2
HIDDEN = 256
OUT_PAD = 128          # lane-dense padded output width (multiple of 128)
BN_EPS = 1e-5


def ddqn_kernel(state_ref, w1_ref, w2v_ref, w2a_ref, bundle_ref, q_ref):
    """Bundle rows: 0:g1  1:b1  2:g2  3:b2  4..4+A-1: w3 action cols (lane-padded)
    4+A: w3 value col (lane-padded)  4+A+1: per-action dueling bias offsets."""
    B = state_ref.shape[0]
    inv_b = 1.0 / B

    # ---- shared trunk: x = state @ W1 (b1 dropped: cancelled by BN mean) ----
    x = jnp.dot(state_ref[...], w1_ref[...],
                preferred_element_type=jnp.float32)                  # (B, 256)

    # ---- trunk BN: one-pass batch stats, computed ONCE for both heads ----
    mu = jnp.sum(x, axis=0, keepdims=True) * inv_b
    ex2 = jnp.sum(x * x, axis=0, keepdims=True) * inv_b
    xn = (x - mu) * jax.lax.rsqrt(ex2 - mu * mu + BN_EPS)            # (B, 256)

    # both heads' BN1 affine + ReLU in one fused lane-dense (B, 512) pass
    xn2 = jnp.concatenate([xn, xn], axis=1)                          # (B, 512)
    h1 = jnp.maximum(xn2 * bundle_ref[0:1, :] + bundle_ref[1:2, :], 0.0)

    # ---- head layer-2: two lane-aligned (B,256)@(256,256) bf16 dots ----
    #      (vb2 / ab2 dropped: cancelled by the following training-mode BN)
    h1v = h1[:, :HIDDEN].astype(jnp.bfloat16)
    h1a = h1[:, HIDDEN:].astype(jnp.bfloat16)
    z2v = jnp.dot(h1v, w2v_ref[...], preferred_element_type=jnp.float32)
    z2a = jnp.dot(h1a, w2a_ref[...], preferred_element_type=jnp.float32)
    z2 = jnp.concatenate([z2v, z2a], axis=1)                         # (B, 512)

    # ---- BN2: one-pass per-feature batch stats over the concatenated acts ----
    mu2 = jnp.sum(z2, axis=0, keepdims=True) * inv_b
    ex22 = jnp.sum(z2 * z2, axis=0, keepdims=True) * inv_b
    h2 = jnp.maximum((z2 - mu2) * jax.lax.rsqrt(ex22 - mu2 * mu2 + BN_EPS)
                     * bundle_ref[2:3, :] + bundle_ref[3:4, :], 0.0)  # (B, 512)

    # ---- head layer-3: three masked row-dot reductions (w3 zeros never DMA'd).
    # Each bundle row is zero on the other head's lanes, so a full (B,512)
    # multiply + lane reduce gives exactly h2_head @ column.
    a_cols = [jnp.sum(h2 * bundle_ref[4 + j:5 + j, :], axis=1, keepdims=True)
              for j in range(ACTION_SIZE)]                            # A x (B,1)
    v = jnp.sum(h2 * bundle_ref[4 + ACTION_SIZE:5 + ACTION_SIZE, :],
                axis=1, keepdims=True)                                # (B, 1)

    a_sum = a_cols[0]
    for j in range(1, ACTION_SIZE):
        a_sum = a_sum + a_cols[j]
    mean_a = jnp.sum(a_sum, keepdims=True) * (1.0 / (B * ACTION_SIZE))  # (1, 1)

    # ---- dueling combine, lane-dense across the padded 128 lanes ----
    # q_j = a_pre_j + v_pre - mean(a_pre) + (ab3_j - mean(ab3) + vb3); the
    # constant per-column offset (last term) is precomputed on the host and
    # stored in the bias row of the bundle.
    col = jax.lax.broadcasted_iota(jnp.int32, (B, OUT_PAD), 1)
    a_b = jnp.zeros((B, OUT_PAD), jnp.float32)
    for j in range(ACTION_SIZE):
        a_b = jnp.where(col == j, a_cols[j], a_b)
    bias_row = 4 + ACTION_SIZE + 1
    c_row = bundle_ref[bias_row:bias_row + 1, :OUT_PAD]               # (1, 128)

    # full, unmasked (B, 128) store; wrapper slices the first ACTION_SIZE lanes
    q_ref[...] = jnp.where(col < ACTION_SIZE, a_b + v - mean_a + c_row, 0.0)


def pack_params(params):
    """Host-side packing of per-layer PyTorch-style params into fused tensors."""
    (w1, b1, vg1, vb1, vw2, vb2, vg2, vbt2, vw3, vb3,
     ag1, ab1, aw2, ab2, ag2, abt2, aw3, ab3) = params
    del b1, vb2, ab2   # cancelled by the training-mode BN mean subtraction
    H = HIDDEN
    zeros_h = jnp.zeros((1, H), jnp.float32)

    rows = [
        jnp.concatenate([vg1, ag1], axis=1),      # row 0: BN1 gamma (both heads)
        jnp.concatenate([vb1, ab1], axis=1),      # row 1: BN1 beta
        jnp.concatenate([vg2, ag2], axis=1),      # row 2: BN2 gamma
        jnp.concatenate([vbt2, abt2], axis=1),    # row 3: BN2 beta
    ]
    # rows 4..4+A-1: advantage-head w3 columns, zero over the value-head lanes
    for j in range(ACTION_SIZE):
        rows.append(jnp.concatenate([zeros_h, aw3[:, j:j + 1].T], axis=1))
    # row 4+A: value-head w3 column, zero over the advantage-head lanes
    rows.append(jnp.concatenate([vw3[:, 0:1].T, zeros_h], axis=1))
    # row 4+A+1: per-action constant offset  ab3_j - mean(ab3) + vb3
    qbias = ab3 - jnp.mean(ab3) + vb3[0, 0]                           # (1, A)
    c_row = jnp.zeros((1, 2 * H), jnp.float32).at[:, :ACTION_SIZE].set(qbias)
    rows.append(c_row)

    bundle = jnp.concatenate(rows, axis=0)                            # (8, 512)
    return (w1,                                   # (4, 256) f32 (tiny, keep f32)
            vw2.astype(jnp.bfloat16),             # (256, 256) bf16
            aw2.astype(jnp.bfloat16),             # (256, 256) bf16
            bundle)                               # (8, 512) f32


def ddqn_forward(state, params):
    B = state.shape[0]
    inputs = (state,) + pack_params(params)
    vmem = pl.BlockSpec(memory_space=pltpu.MemorySpace.VMEM)
    flops = 2 * B * (STATE_SIZE * HIDDEN
                     + 2 * HIDDEN * HIDDEN
                     + 2 * HIDDEN * (ACTION_SIZE + 1))
    bytes_accessed = (sum(int(v.size) * v.dtype.itemsize for v in inputs)
                      + B * OUT_PAD * 4)
    q_pad = pl.pallas_call(
        ddqn_kernel,
        out_shape=jax.ShapeDtypeStruct((B, OUT_PAD), jnp.float32),
        in_specs=[vmem] * len(inputs),
        out_specs=vmem,
        cost_estimate=pl.CostEstimate(flops=flops,
                                      transcendentals=3 * HIDDEN,
                                      bytes_accessed=bytes_accessed),
    )(*inputs)
    return q_pad[:, :ACTION_SIZE]


def init_params(key):
    """PyTorch-module-shaped params (all biases present, weights stored (in, out))."""
    ks = jax.random.split(key, 6)

    def lin(k, fan_in, fan_out):
        w = jax.random.normal(k, (fan_in, fan_out), jnp.float32) / jnp.sqrt(fan_in)
        b = jnp.zeros((1, fan_out), jnp.float32) + 0.01
        return w, b

    w1, b1 = lin(ks[0], STATE_SIZE, HIDDEN)

    vg1 = jnp.ones((1, HIDDEN), jnp.float32)
    vb1 = jnp.zeros((1, HIDDEN), jnp.float32)
    vw2, vb2 = lin(ks[1], HIDDEN, HIDDEN)
    vg2 = jnp.ones((1, HIDDEN), jnp.float32)
    vbt2 = jnp.zeros((1, HIDDEN), jnp.float32)
    vw3, vb3 = lin(ks[2], HIDDEN, 1)

    ag1 = jnp.ones((1, HIDDEN), jnp.float32)
    ab1 = jnp.zeros((1, HIDDEN), jnp.float32)
    aw2, ab2 = lin(ks[3], HIDDEN, HIDDEN)
    ag2 = jnp.ones((1, HIDDEN), jnp.float32)
    abt2 = jnp.zeros((1, HIDDEN), jnp.float32)
    aw3, ab3 = lin(ks[4], HIDDEN, ACTION_SIZE)

    return (w1, b1,
            vg1, vb1, vw2, vb2, vg2, vbt2, vw3, vb3,
            ag1, ab1, aw2, ab2, ag2, abt2, aw3, ab3)


def ddqn_reference(state, params):
    """Pure-JAX transcription of the PyTorch module forward (training-mode BN)."""
    (w1, b1, vg1, vb1, vw2, vb2, vg2, vbt2, vw3, vb3,
     ag1, ab1, aw2, ab2, ag2, abt2, aw3, ab3) = params

    def bn_relu(x, g, b):
        mu = jnp.mean(x, axis=0, keepdims=True)
        var = jnp.mean((x - mu) ** 2, axis=0, keepdims=True)
        return jnp.maximum((x - mu) * jax.lax.rsqrt(var + BN_EPS) * g + b, 0.0)

    x = state @ w1 + b1
    h = bn_relu(x, vg1, vb1)
    v = bn_relu(h @ vw2 + vb2, vg2, vbt2) @ vw3 + vb3
    g = bn_relu(x, ag1, ab1)
    a = bn_relu(g @ aw2 + ab2, ag2, abt2) @ aw3 + ab3
    return v + (a - jnp.mean(a))        # torch.mean(a) is a global mean


if __name__ == "__main__":
    key = jax.random.PRNGKey(0)
    k_param, k_state = jax.random.split(key)

    B = 8  # small batch
    params = init_params(k_param)
    state = jax.random.normal(k_state, (B, STATE_SIZE), jnp.float32)

    q = ddqn_forward(state, params)
    jax.block_until_ready(q)

    q_ref = ddqn_reference(state, params)
    assert q.shape == (B, ACTION_SIZE)
    # bf16 layer-2 weights/activations -> relaxed tolerance (review item 2)
    assert jnp.allclose(q, q_ref, atol=5e-2, rtol=5e-2), (q, q_ref)

    print("KERNEL_OK")
</pallas_src>

<mosaic_0001>
module attributes {stable_mosaic.version = 11 : i64} {
  func.func @ddqn_kernel(%arg0: memref<8x4xf32, #tpu.memory_space<vmem>>, %arg1: memref<4x256xf32, #tpu.memory_space<vmem>>, %arg2: memref<256x256xbf16, #tpu.memory_space<vmem>>, %arg3: memref<256x256xbf16, #tpu.memory_space<vmem>>, %arg4: memref<8x512xf32, #tpu.memory_space<vmem>>, %arg5: memref<8x128xf32, #tpu.memory_space<vmem>>) attributes {dimension_semantics = [], scalar_prefetch = 0 : i64, scratch_operands = 0 : i64, tpu.core_type = #tpu.core_type<tc>} {
    %c0 = arith.constant 0 : index
    %c0_0 = arith.constant 0 : index
    %0 = vector.load %arg0[%c0, %c0_0] : memref<8x4xf32, #tpu.memory_space<vmem>>, vector<8x4xf32>
    %c0_1 = arith.constant 0 : index
    %c0_2 = arith.constant 0 : index
    %1 = vector.load %arg1[%c0_1, %c0_2] : memref<4x256xf32, #tpu.memory_space<vmem>>, vector<4x256xf32>
    %cst = arith.constant dense<0.000000e+00> : vector<8x256xf32>
    %2 = tpu.matmul %0, %1, %cst {dimension_numbers = #tpu.dot_dimension_numbers<[1], [0], [0], [1], [0, 0, 1, 1], [], []>} : vector<8x4xf32>, vector<4x256xf32>, vector<8x256xf32> -> vector<8x256xf32>
    %cst_3 = arith.constant dense<0.000000e+00> : vector<256xf32>
    %3 = vector.multi_reduction <add>, %2, %cst_3 [0] : vector<8x256xf32> to vector<256xf32>
    %4 = vector.shape_cast %3 : vector<256xf32> to vector<1x256xf32>
    %cst_4 = arith.constant 1.250000e-01 : f32
    %5 = vector.broadcast %cst_4 : f32 to vector<1x256xf32>
    %6 = arith.mulf %4, %5 : vector<1x256xf32>
    %7 = arith.mulf %2, %2 : vector<8x256xf32>
    %cst_5 = arith.constant dense<0.000000e+00> : vector<256xf32>
    %8 = vector.multi_reduction <add>, %7, %cst_5 [0] : vector<8x256xf32> to vector<256xf32>
    %9 = vector.shape_cast %8 : vector<256xf32> to vector<1x256xf32>
    %cst_6 = arith.constant 1.250000e-01 : f32
    %10 = vector.broadcast %cst_6 : f32 to vector<1x256xf32>
    %11 = arith.mulf %9, %10 : vector<1x256xf32>
    %12 = vector.broadcast %6 : vector<1x256xf32> to vector<8x256xf32>
    %13 = arith.subf %2, %12 : vector<8x256xf32>
    %14 = arith.mulf %6, %6 : vector<1x256xf32>
    %15 = arith.subf %11, %14 : vector<1x256xf32>
    %cst_7 = arith.constant 9.99999974E-6 : f32
    %16 = vector.broadcast %cst_7 : f32 to vector<1x256xf32>
    %17 = arith.addf %15, %16 : vector<1x256xf32>
    %18 = math.rsqrt %17 : vector<1x256xf32>
    %19 = vector.broadcast %18 : vector<1x256xf32> to vector<8x256xf32>
    %20 = arith.mulf %13, %19 : vector<8x256xf32>
    %21 = tpu.concatenate %20, %20 in 1 : vector<8x256xf32>, vector<8x256xf32> -> vector<8x512xf32>
    %c0_8 = arith.constant 0 : index
    %c0_9 = arith.constant 0 : index
    %22 = vector.load %arg4[%c0_8, %c0_9] : memref<8x512xf32, #tpu.memory_space<vmem>>, vector<1x512xf32>
    %23 = vector.broadcast %22 : vector<1x512xf32> to vector<8x512xf32>
    %24 = arith.mulf %21, %23 : vector<8x512xf32>
    %c1 = arith.constant 1 : index
    %c0_10 = arith.constant 0 : index
    %25 = vector.load %arg4[%c1, %c0_10] : memref<8x512xf32, #tpu.memory_space<vmem>>, vector<1x512xf32>
    %26 = vector.broadcast %25 : vector<1x512xf32> to vector<8x512xf32>
    %27 = arith.addf %24, %26 : vector<8x512xf32>
    %cst_11 = arith.constant 0.000000e+00 : f32
    %28 = vector.broadcast %cst_11 : f32 to vector<8x512xf32>
    %29 = arith.maximumf %27, %28 : vector<8x512xf32>
    %30 = vector.extract_strided_slice %29 {offsets = [0, 0], sizes = [8, 256], strides = [1, 1]} : vector<8x512xf32> to vector<8x256xf32>
    %31 = arith.truncf %30 : vector<8x256xf32> to vector<8x256xbf16>
    %32 = vector.extract_strided_slice %29 {offsets = [0, 256], sizes = [8, 256], strides = [1, 1]} : vector<8x512xf32> to vector<8x256xf32>
    %33 = arith.truncf %32 : vector<8x256xf32> to vector<8x256xbf16>
    %c0_12 = arith.constant 0 : index
    %c0_13 = arith.constant 0 : index
    %34 = vector.load %arg2[%c0_12, %c0_13] : memref<256x256xbf16, #tpu.memory_space<vmem>>, vector<256x256xbf16>
    %cst_14 = arith.constant dense<0.000000e+00> : vector<8x256xf32>
    %35 = tpu.matmul %31, %34, %cst_14 {dimension_numbers = #tpu.dot_dimension_numbers<[1], [0], [0], [1], [0, 0, 1, 1], [], []>} : vector<8x256xbf16>, vector<256x256xbf16>, vector<8x256xf32> -> vector<8x256xf32>
    %c0_15 = arith.constant 0 : index
    %c0_16 = arith.constant 0 : index
    %36 = vector.load %arg3[%c0_15, %c0_16] : memref<256x256xbf16, #tpu.memory_space<vmem>>, vector<256x256xbf16>
    %cst_17 = arith.constant dense<0.000000e+00> : vector<8x256xf32>
    %37 = tpu.matmul %33, %36, %cst_17 {dimension_numbers = #tpu.dot_dimension_numbers<[1], [0], [0], [1], [0, 0, 1, 1], [], []>} : vector<8x256xbf16>, vector<256x256xbf16>, vector<8x256xf32> -> vector<8x256xf32>
    %38 = tpu.concatenate %35, %37 in 1 : vector<8x256xf32>, vector<8x256xf32> -> vector<8x512xf32>
    %cst_18 = arith.constant dense<0.000000e+00> : vector<512xf32>
    %39 = vector.multi_reduction <add>, %38, %cst_18 [0] : vector<8x512xf32> to vector<512xf32>
    %40 = vector.shape_cast %39 : vector<512xf32> to vector<1x512xf32>
    %cst_19 = arith.constant 1.250000e-01 : f32
    %41 = vector.broadcast %cst_19 : f32 to vector<1x512xf32>
    %42 = arith.mulf %40, %41 : vector<1x512xf32>
    %43 = arith.mulf %38, %38 : vector<8x512xf32>
    %cst_20 = arith.constant dense<0.000000e+00> : vector<512xf32>
    %44 = vector.multi_reduction <add>, %43, %cst_20 [0] : vector<8x512xf32> to vector<512xf32>
    %45 = vector.shape_cast %44 : vector<512xf32> to vector<1x512xf32>
    %cst_21 = arith.constant 1.250000e-01 : f32
    %46 = vector.broadcast %cst_21 : f32 to vector<1x512xf32>
    %47 = arith.mulf %45, %46 : vector<1x512xf32>
    %48 = vector.broadcast %42 : vector<1x512xf32> to vector<8x512xf32>
    %49 = arith.subf %38, %48 : vector<8x512xf32>
    %50 = arith.mulf %42, %42 : vector<1x512xf32>
    %51 = arith.subf %47, %50 : vector<1x512xf32>
    %cst_22 = arith.constant 9.99999974E-6 : f32
    %52 = vector.broadcast %cst_22 : f32 to vector<1x512xf32>
    %53 = arith.addf %51, %52 : vector<1x512xf32>
    %54 = math.rsqrt %53 : vector<1x512xf32>
    %55 = vector.broadcast %54 : vector<1x512xf32> to vector<8x512xf32>
    %56 = arith.mulf %49, %55 : vector<8x512xf32>
    %c2 = arith.constant 2 : index
    %c0_23 = arith.constant 0 : index
    %57 = vector.load %arg4[%c2, %c0_23] : memref<8x512xf32, #tpu.memory_space<vmem>>, vector<1x512xf32>
    %58 = vector.broadcast %57 : vector<1x512xf32> to vector<8x512xf32>
    %59 = arith.mulf %56, %58 : vector<8x512xf32>
    %c3 = arith.constant 3 : index
    %c0_24 = arith.constant 0 : index
    %60 = vector.load %arg4[%c3, %c0_24] : memref<8x512xf32, #tpu.memory_space<vmem>>, vector<1x512xf32>
    %61 = vector.broadcast %60 : vector<1x512xf32> to vector<8x512xf32>
    %62 = arith.addf %59, %61 : vector<8x512xf32>
    %cst_25 = arith.constant 0.000000e+00 : f32
    %63 = vector.broadcast %cst_25 : f32 to vector<8x512xf32>
    %64 = arith.maximumf %62, %63 : vector<8x512xf32>
    %c4 = arith.constant 4 : index
    %c0_26 = arith.constant 0 : index
    %65 = vector.load %arg4[%c4, %c0_26] : memref<8x512xf32, #tpu.memory_space<vmem>>, vector<1x512xf32>
    %66 = vector.broadcast %65 : vector<1x512xf32> to vector<8x512xf32>
    %67 = arith.mulf %64, %66 : vector<8x512xf32>
    %cst_27 = arith.constant dense<0.000000e+00> : vector<8xf32>
    %68 = vector.multi_reduction <add>, %67, %cst_27 [1] : vector<8x512xf32> to vector<8xf32>
    %69 = vector.shape_cast %68 : vector<8xf32> to vector<8x1xf32>
    %c5 = arith.constant 5 : index
    %c0_28 = arith.constant 0 : index
    %70 = vector.load %arg4[%c5, %c0_28] : memref<8x512xf32, #tpu.memory_space<vmem>>, vector<1x512xf32>
    %71 = vector.broadcast %70 : vector<1x512xf32> to vector<8x512xf32>
    %72 = arith.mulf %64, %71 : vector<8x512xf32>
    %cst_29 = arith.constant dense<0.000000e+00> : vector<8xf32>
    %73 = vector.multi_reduction <add>, %72, %cst_29 [1] : vector<8x512xf32> to vector<8xf32>
    %74 = vector.shape_cast %73 : vector<8xf32> to vector<8x1xf32>
    %c6 = arith.constant 6 : index
    %c0_30 = arith.constant 0 : index
    %75 = vector.load %arg4[%c6, %c0_30] : memref<8x512xf32, #tpu.memory_space<vmem>>, vector<1x512xf32>
    %76 = vector.broadcast %75 : vector<1x512xf32> to vector<8x512xf32>
    %77 = arith.mulf %64, %76 : vector<8x512xf32>
    %cst_31 = arith.constant dense<0.000000e+00> : vector<8xf32>
    %78 = vector.multi_reduction <add>, %77, %cst_31 [1] : vector<8x512xf32> to vector<8xf32>
    %79 = vector.shape_cast %78 : vector<8xf32> to vector<8x1xf32>
    %80 = arith.addf %69, %74 : vector<8x1xf32>
    %81 = vector.shape_cast %80 : vector<8x1xf32> to vector<1x8x1xf32>
    %cst_32 = arith.constant dense<0.000000e+00> : vector<1xf32>
    %82 = vector.multi_reduction <add>, %81, %cst_32 [1, 2] : vector<1x8x1xf32> to vector<1xf32>
    %83 = vector.shape_cast %82 : vector<1xf32> to vector<1x1x1xf32>
    %84 = vector.extract %83[0, 0, 0] : f32 from vector<1x1x1xf32>
    %85 = vector.broadcast %84 : f32 to vector<1x1xf32>
    %cst_33 = arith.constant 6.250000e-02 : f32
    %86 = vector.broadcast %cst_33 : f32 to vector<1x1xf32>
    %87 = arith.mulf %85, %86 : vector<1x1xf32>
    %88 = tpu.iota {dimensions = array<i32: 1>} : vector<8x128xi32>
    %cst_34 = arith.constant 0.000000e+00 : f32
    %89 = vector.broadcast %cst_34 : f32 to vector<8x128xf32>
    %c0_i32 = arith.constant 0 : i32
    %90 = vector.broadcast %c0_i32 : i32 to vector<8x128xi32>
    %91 = arith.cmpi eq, %88, %90 : vector<8x128xi32>
    %92 = vector.shape_cast %69 : vector<8x1xf32> to vector<8x1xf32>
    %93 = vector.broadcast %92 : vector<8x1xf32> to vector<8x128xf32>
    %94 = arith.select %91, %93, %89 : vector<8x128xi1>, vector<8x128xf32>
    %c1_i32 = arith.constant 1 : i32
    %95 = vector.broadcast %c1_i32 : i32 to vector<8x128xi32>
    %96 = arith.cmpi eq, %88, %95 : vector<8x128xi32>
    %97 = vector.shape_cast %74 : vector<8x1xf32> to vector<8x1xf32>
    %98 = vector.broadcast %97 : vector<8x1xf32> to vector<8x128xf32>
    %99 = arith.select %96, %98, %94 : vector<8x128xi1>, vector<8x128xf32>
    %c7 = arith.constant 7 : index
    %c0_35 = arith.constant 0 : index
    %100 = vector.load %arg4[%c7, %c0_35] : memref<8x512xf32, #tpu.memory_space<vmem>>, vector<1x128xf32>
    %c2_i32 = arith.constant 2 : i32
    %101 = vector.broadcast %c2_i32 : i32 to vector<8x128xi32>
    %102 = arith.cmpi slt, %88, %101 : vector<8x128xi32>
    %103 = vector.broadcast %79 : vector<8x1xf32> to vector<8x128xf32>
    %104 = arith.addf %99, %103 : vector<8x128xf32>
    %105 = vector.broadcast %87 : vector<1x1xf32> to vector<8x128xf32>
    %106 = arith.subf %104, %105 : vector<8x128xf32>
    %107 = vector.broadcast %100 : vector<1x128xf32> to vector<8x128xf32>
    %108 = arith.addf %106, %107 : vector<8x128xf32>
    %cst_36 = arith.constant 0.000000e+00 : f32
    %109 = vector.broadcast %cst_36 : f32 to vector<8x128xf32>
    %110 = arith.select %102, %108, %109 : vector<8x128xi1>, vector<8x128xf32>
    %c0_37 = arith.constant 0 : index
    %c0_38 = arith.constant 0 : index
    %111 = vector.load %arg5[%c0_37, %c0_38] : memref<8x128xf32, #tpu.memory_space<vmem>>, vector<8x128xf32>
    tpu.vector_store %arg5[%c0_37, %c0_38], %110 {strides = array<i32>} : memref<8x128xf32, #tpu.memory_space<vmem>>, vector<8x128xf32>,
    return
  }
}

</mosaic_0001>

<bundles_post_ra>
// kernel: tpu_custom_call.1
= control target key start
LH: loop header
LB: loop body
LE: loop exit
PB: predicated region body
PF: predicated region fallthrough
CT: control target
= control target key end

     0   :  { %10 = vsyncpa [#allocation3], 0  ;;  %s1553_s0 = inlined_call_operand.vmem [shape: f32[8,4], index: 0, kind: input, shape index: {}]   ;;  %s1554_s1 = inlined_call_operand.vmem [shape: f32[4,256], index: 1, kind: input, shape index: {}]   ;;  %s1555_s2 = inlined_call_operand.hbm [shape: bf16[256,256], index: 2, kind: input, shape index: {}]   ;;  %s1556_s3 = inlined_call_operand.hbm [shape: bf16[256,256], index: 3, kind: input, shape index: {}]   ;;  %s1557_s4 = inlined_call_operand.hbm [shape: f32[8,512], index: 4, kind: input, shape index: {}]   ;;  %s1558_s5 = inlined_call_operand.hbm [shape: f32[8,128], index: 5, kind: output, shape index: {}]  }
   0x1   :  { %11 = vsyncpa [#allocation6], 0 }
   0x2   :  { %12 = vsyncpa [#allocation4], 0  ;;  %s34_s20 = sshll.u32 %s1556_s3, 4  ;;  %s1411_s21 = smov [#allocation5]   ;;  %s35_s20 = int_to_ptr.hbm [resolvable:$true] %s34_s20 }
   0x3   :  { %s36_s22 = sshll.u32 %s1411_s21, 4  ;;  %s21_s25 = sshll.u32 %s1555_s2, 4  ;;  %s37_s22 = int_to_ptr.vmem [resolvable:$true] %s36_s22  ;;  %s22_s25 = int_to_ptr.hbm [resolvable:$true] %s21_s25 }
   0x4   :  { %s1412_s26 = smov 128   ;;  %s1413_s27 = smov 8  }
   0x5   :  { %42 = dma.hbm_to_vmem [thread:$0]  %s35_s20, 4096, %s37_s22, [#allocation6], %s1412_s26, %s1412_s26, %s1413_s27  }
   0x6   :  { %s1414_s28 = smov [#allocation2]   ;;  %s48_s7 = sshll.u32 %s1557_s4, 4  ;;  %s49_s7 = int_to_ptr.hbm [resolvable:$true] %s48_s7 }
   0x7   :  { %s23_s29 = sshll.u32 %s1414_s28, 4  ;;  %s1415_s3 = smov [#allocation7]   ;;  %s24_s29 = int_to_ptr.vmem [resolvable:$true] %s23_s29 }
   0x8   :  { %29 = dma.hbm_to_vmem [thread:$0]  %s22_s25, 4096, %s24_s29, [#allocation3], %s1412_s26, %s1412_s26, %s1413_s27  }
   0x9   :  { %s50_s8 = sshll.u32 %s1415_s3, 4  ;;  %s51_s8 = int_to_ptr.vmem [resolvable:$true] %s50_s8 }
   0xa   :  { %53 = dma.hbm_to_vmem [thread:$0]  %s49_s7, 512, %s51_s8, [#allocation6]  }
   0xb   :  { %1405 = dma.done.wait [#allocation3], 4096  }
   0xc   :  { %1406 = vsyncadd [#allocation3], 4294963200 }
   0xd   :  { %1407 = dma.done.wait [#allocation6], 4608  }
   0xe   :  { %1408 = vsyncadd [#allocation6], 4294962688  ;;  %v67_v0 = vld [vmem:[%s1554_s1] sm:$0xff]  ;;  %vm76_vm0 = vcmask 1043456   ;;  %vm72_vm1 = vcmask 31744   ;;  %s1416_s1 = smov [#allocation8]  }
   0xf   :  { %69 = vst [vmem:[#allocation1] ss:$2 sm:$0xff] %v67_v0  ;;  %v66_v1 = vld [vmem:[%s1553_s0] sm:$0xff]  ;;  %v1027_v4 = vld [vmem:[#allocation2 + $0x70] sm:$0xf]  ;;  %s952_s4 = sshll.u32 %s1416_s1, 4  ;;  %s953_s4 = int_to_ptr.vmem [resolvable:$true] %s952_s4 }
  0x10   :  { %v1240_v5 = vld [vmem:[#allocation2 + $0x74] sm:$0xf0]  ;;  %v1091_v6 = vld [vmem:[#allocation2 + $0xf0] sm:$0xf]  ;;  %v1239_v9 = vld [vmem:[#allocation2 + $0x74] sm:$0xf] }
  0x11   :  { %v1028_v7 = vor.u32 %v1240_v5, %v1027_v4  ;;  %v1256_v8 = vld [vmem:[#allocation2 + $0xf4] sm:$0xf0]  ;;  %v1029_v10 = vld [vmem:[#allocation2 + $0x78] sm:$0xf0]  ;;  %v1255_v13 = vld [vmem:[#allocation2 + $0xf4] sm:$0xf] }
  0x12   :  { %v1092_v11 = vor.u32 %v1256_v8, %v1091_v6  ;;  %v1032_v12 = vor.u32 %v1239_v9, %v1029_v10  ;;  %v1093_v14 = vld [vmem:[#allocation2 + $0xf8] sm:$0xf0]  ;;  %v1019_v16 = vld [vmem:[#allocation2 + $0x60] sm:$0xf]  ;;  %v1238_v17 = vld [vmem:[#allocation2 + $0x64] sm:$0xf0] }
  0x13   :  { %410 = vmatpush.bf16.msra.mxu2 %v1028_v7  ;;  %v1096_v15 = vor.u32 %v1255_v13, %v1093_v14  ;;  %v1083_v18 = vld [vmem:[#allocation2 + $0xe0] sm:$0xf]  ;;  %v1020_v19 = vor.u32 %v1238_v17, %v1019_v16  ;;  %v1254_v20 = vld [vmem:[#allocation2 + $0xe4] sm:$0xf0]  ;;  %v1237_v21 = vld [vmem:[#allocation2 + $0x64] sm:$0xf] }
  0x14   :  { %423 = vmatpush.bf16.msra.mxu3 %v1092_v11  ;;  %v1021_v22 = vld [vmem:[#allocation2 + $0x68] sm:$0xf0]  ;;  %v1084_v23 = vor.u32 %v1254_v20, %v1083_v18  ;;  %v1253_v25 = vld [vmem:[#allocation2 + $0xe4] sm:$0xf]  ;;  %v1011_v28 = vld [vmem:[#allocation2 + $0x50] sm:$0xf] }
  0x15   :  { %v1024_v24 = vor.u32 %v1237_v21, %v1021_v22  ;;  %v1085_v26 = vld [vmem:[#allocation2 + $0xe8] sm:$0xf0]  ;;  %v1236_v29 = vld [vmem:[#allocation2 + $0x54] sm:$0xf0]  ;;  %v1075_v30 = vld [vmem:[#allocation2 + $0xd0] sm:$0xf] }
  0x16   :  { %v70_v2 = vld.sshfl [vmem:[#allocation1] sm:$0xff pattern:$0x75316420]  ;;  %v71_v3 = vld.sshfl [vmem:[#allocation1 + $0x8] sm:$0xff pattern:$0x75316420]  ;;  %v1088_v27 = vor.u32 %v1253_v25, %v1085_v26  ;;  %v1012_v31 = vor.u32 %v1236_v29, %v1011_v28 }
  0x17   :  { %965 = vmatpush.msk.msra.mxu0 %vm76_vm0, %v70_v2  ;;  %967 = vmatpush.msk.msra.mxu1 %vm76_vm0, %v71_v3  ;;  %v1252_v32 = vld [vmem:[#allocation2 + $0xd4] sm:$0xf0]  ;;  %v1235_v33 = vld [vmem:[#allocation2 + $0x54] sm:$0xf]  ;;  %v1013_v34 = vld [vmem:[#allocation2 + $0x58] sm:$0xf0] }
  0x18   :  { %966 = vmatmul.msk.f32.vlgmr.msra.gmra.mxu0 %vm72_vm1, %v66_v1  ;;  %968 = vmatmul.msk.f32.vlgmr.msra.gmra.mxu1 %vm72_vm1, %v66_v1  ;;  %v1076_v35 = vor.u32 %v1252_v32, %v1075_v30  ;;  %v1016_v36 = vor.u32 %v1235_v33, %v1013_v34  ;;  %v1251_v37 = vld [vmem:[#allocation2 + $0xd4] sm:$0xf]  ;;  %v1077_v38 = vld [vmem:[#allocation2 + $0xd8] sm:$0xf0]  ;;  %v1003_v40 = vld [vmem:[#allocation2 + $0x40] sm:$0xf] }
  0x19   :  { %436 = vmatpush.bf16.msrb.mxu0 %v1032_v12  ;;  %449 = vmatpush.bf16.msrb.mxu1 %v1096_v15  ;;  %v1080_v39 = vor.u32 %v1251_v37, %v1077_v38  ;;  %v1234_v41 = vld [vmem:[#allocation2 + $0x44] sm:$0xf0]  ;;  %v1067_v42 = vld [vmem:[#allocation2 + $0xc0] sm:$0xf]  ;;  %v1233_v45 = vld [vmem:[#allocation2 + $0x44] sm:$0xf] }
  0x1a   :  { %411 = vmatpush.bf16.msra.mxu2 %v1020_v19  ;;  %424 = vmatpush.bf16.msra.mxu3 %v1084_v23  ;;  %v1004_v43 = vor.u32 %v1234_v41, %v1003_v40  ;;  %v1250_v44 = vld [vmem:[#allocation2 + $0xc4] sm:$0xf0]  ;;  %v1005_v46 = vld [vmem:[#allocation2 + $0x48] sm:$0xf0]  ;;  %v1249_v49 = vld [vmem:[#allocation2 + $0xc4] sm:$0xf] }
  0x1b   :  { %v1068_v47 = vor.u32 %v1250_v44, %v1067_v42  ;;  %v1008_v48 = vor.u32 %v1233_v45, %v1005_v46  ;;  %v1069_v50 = vld [vmem:[#allocation2 + $0xc8] sm:$0xf0]  ;;  %v995_v52 = vld [vmem:[#allocation2 + $0x30] sm:$0xf]  ;;  %v1232_v53 = vld [vmem:[#allocation2 + $0x34] sm:$0xf0] }
  0x1c   :  { %v1072_v51 = vor.u32 %v1249_v49, %v1069_v50  ;;  %v1059_v54 = vld [vmem:[#allocation2 + $0xb0] sm:$0xf]  ;;  %v996_v55 = vor.u32 %v1232_v53, %v995_v52  ;;  %v1248_v56 = vld [vmem:[#allocation2 + $0xb4] sm:$0xf0]  ;;  %v1231_v57 = vld [vmem:[#allocation2 + $0x34] sm:$0xf] }
  0x1d   :  { %437 = vmatpush.bf16.msrb.mxu0 %v1024_v24  ;;  %450 = vmatpush.bf16.msrb.mxu1 %v1088_v27  ;;  %v997_v58 = vld [vmem:[#allocation2 + $0x38] sm:$0xf0]  ;;  %v1060_v59 = vor.u32 %v1248_v56, %v1059_v54  ;;  %v1247_v61 = vld [vmem:[#allocation2 + $0xb4] sm:$0xf]  ;;  %v987_v0 = vld [vmem:[#allocation2 + $0x20] sm:$0xf] }
  0x1e   :  { %412 = vmatpush.bf16.msra.mxu2 %v1012_v31  ;;  %425 = vmatpush.bf16.msra.mxu3 %v1076_v35  ;;  %v1000_v60 = vor.u32 %v1231_v57, %v997_v58  ;;  %v1061_v62 = vld [vmem:[#allocation2 + $0xb8] sm:$0xf0]  ;;  %v1230_v1 = vld [vmem:[#allocation2 + $0x24] sm:$0xf0]  ;;  %v1051_v2 = vld [vmem:[#allocation2 + $0xa0] sm:$0xf] }
  0x1f   :  { %v1064_v63 = vor.u32 %v1247_v61, %v1061_v62  ;;  %v988_v3 = vor.u32 %v1230_v1, %v987_v0  ;;  %v1246_v4 = vld [vmem:[#allocation2 + $0xa4] sm:$0xf0]  ;;  %v1229_v5 = vld [vmem:[#allocation2 + $0x24] sm:$0xf]  ;;  %v989_v6 = vld [vmem:[#allocation2 + $0x28] sm:$0xf0] }
  0x20   :  { %v1052_v7 = vor.u32 %v1246_v4, %v1051_v2  ;;  %v992_v8 = vor.u32 %v1229_v5, %v989_v6  ;;  %v1245_v9 = vld [vmem:[#allocation2 + $0xa4] sm:$0xf]  ;;  %v1053_v10 = vld [vmem:[#allocation2 + $0xa8] sm:$0xf0]  ;;  %v979_v12 = vld [vmem:[#allocation2 + $0x10] sm:$0xf] }
  0x21   :  { %438 = vmatpush.bf16.msrb.mxu0 %v1016_v36  ;;  %451 = vmatpush.bf16.msrb.mxu1 %v1080_v39  ;;  %v1056_v11 = vor.u32 %v1245_v9, %v1053_v10  ;;  %v1228_v13 = vld [vmem:[#allocation2 + $0x14] sm:$0xf0]  ;;  %v1043_v14 = vld [vmem:[#allocation2 + $0x90] sm:$0xf]  ;;  %v1227_v17 = vld [vmem:[#allocation2 + $0x14] sm:$0xf] }
  0x22   :  { %413 = vmatpush.bf16.msra.mxu2 %v1004_v43  ;;  %426 = vmatpush.bf16.msra.mxu3 %v1068_v47  ;;  %v980_v15 = vor.u32 %v1228_v13, %v979_v12  ;;  %v1244_v16 = vld [vmem:[#allocation2 + $0x94] sm:$0xf0]  ;;  %v981_v18 = vld [vmem:[#allocation2 + $0x18] sm:$0xf0]  ;;  %v1243_v21 = vld [vmem:[#allocation2 + $0x94] sm:$0xf] }
  0x23   :  { %v1044_v19 = vor.u32 %v1244_v16, %v1043_v14  ;;  %v984_v20 = vor.u32 %v1227_v17, %v981_v18  ;;  %v1045_v22 = vld [vmem:[#allocation2 + $0x98] sm:$0xf0]  ;;  %v971_v23 = vld [vmem:[#allocation2] sm:$0xf]  ;;  %v1226_v25 = vld [vmem:[#allocation2 + $0x4] sm:$0xf0] }
  0x24   :  { %v1048_v24 = vor.u32 %v1243_v21, %v1045_v22  ;;  %v1035_v26 = vld [vmem:[#allocation2 + $0x80] sm:$0xf]  ;;  %v1242_v27 = vld [vmem:[#allocation2 + $0x84] sm:$0xf0]  ;;  %v972_v28 = vor.u32 %v1226_v25, %v971_v23  ;;  %v1225_v30 = vld [vmem:[#allocation2 + $0x4] sm:$0xf] }
  0x25   :  { %439 = vmatpush.bf16.msrb.mxu0 %v1008_v48  ;;  %452 = vmatpush.bf16.msrb.mxu1 %v1072_v51  ;;  %v1036_v29 = vor.u32 %v1242_v27, %v1035_v26  ;;  %v973_v31 = vld [vmem:[#allocation2 + $0x8] sm:$0xf0]  ;;  %v1241_v32 = vld [vmem:[#allocation2 + $0x84] sm:$0xf]  ;;  %v1155_v37 = vld [vmem:[#allocation5 + $0x70] sm:$0xf] }
  0x26   :  { %414 = vmatpush.bf16.msra.mxu2 %v996_v55  ;;  %427 = vmatpush.bf16.msra.mxu3 %v1060_v59  ;;  %v976_v35 = vor.u32 %v1225_v30, %v973_v31  ;;  %v1037_v36 = vld [vmem:[#allocation2 + $0x88] sm:$0xf0]  ;;  %v1272_v38 = vld [vmem:[#allocation5 + $0x74] sm:$0xf0]  ;;  %v1219_v43 = vld [vmem:[#allocation5 + $0xf0] sm:$0xf] }
  0x27   :  { %v1288_v44 = vld [vmem:[#allocation5 + $0xf4] sm:$0xf0]  ;;  %v1040_v45 = vor.u32 %v1241_v32, %v1037_v36  ;;  %v1156_v46 = vor.u32 %v1272_v38, %v1155_v37  ;;  %v1271_v48 = vld [vmem:[#allocation5 + $0x74] sm:$0xf]  ;;  %v1157_v49 = vld [vmem:[#allocation5 + $0x78] sm:$0xf0] }
  0x28   :  { %v1220_v47 = vor.u32 %v1288_v44, %v1219_v43  ;;  %v1287_v50 = vld [vmem:[#allocation5 + $0xf4] sm:$0xf]  ;;  %v1221_v55 = vld [vmem:[#allocation5 + $0xf8] sm:$0xf0]  ;;  %v1147_v56 = vld [vmem:[#allocation5 + $0x60] sm:$0xf]  ;;  %v1160_v57 = vor.u32 %v1271_v48, %v1157_v49 }
  0x29   :  { %440 = vmatpush.bf16.msrb.mxu0 %v1000_v60  ;;  %453 = vmatpush.bf16.msrb.mxu1 %v1064_v63  ;;  %v1224_v58 = vor.u32 %v1287_v50, %v1221_v55  ;;  %v1270_v59 = vld [vmem:[#allocation5 + $0x64] sm:$0xf0]  ;;  %v1211_v60 = vld [vmem:[#allocation5 + $0xe0] sm:$0xf]  ;;  %v1269_v2 = vld [vmem:[#allocation5 + $0x64] sm:$0xf] }
  0x2a   :  { %415 = vmatpush.bf16.msra.mxu2 %v988_v3  ;;  %428 = vmatpush.bf16.msra.mxu3 %v1052_v7  ;;  %v1286_v61 = vld [vmem:[#allocation5 + $0xe4] sm:$0xf0]  ;;  %v1149_v3 = vld [vmem:[#allocation5 + $0x68] sm:$0xf0]  ;;  %v1148_v4 = vor.u32 %v1270_v59, %v1147_v56  ;;  %v1285_v7 = vld [vmem:[#allocation5 + $0xe4] sm:$0xf] }
  0x2b   :  { %v1212_v5 = vor.u32 %v1286_v61, %v1211_v60  ;;  %v1152_v6 = vor.u32 %v1269_v2, %v1149_v3  ;;  %v1139_v9 = vld [vmem:[#allocation5 + $0x50] sm:$0xf]  ;;  %v1268_v14 = vld [vmem:[#allocation5 + $0x54] sm:$0xf0]  ;;  %v1283_v25 = vld [vmem:[#allocation5 + $0xd4] sm:$0xf] }
  0x2c   :  { %v1140_v17 = vor.u32 %v1268_v14, %v1139_v9  ;;  %v1284_v18 = vld [vmem:[#allocation5 + $0xd4] sm:$0xf0]  ;;  %v1205_v26 = vld [vmem:[#allocation5 + $0xd8] sm:$0xf0]  ;;  %v1131_v30 = vld [vmem:[#allocation5 + $0x40] sm:$0xf] }
  0x2d   :  { %441 = vmatpush.bf16.msrb.mxu0 %v992_v8  ;;  %454 = vmatpush.bf16.msrb.mxu1 %v1056_v11  ;;  %v1213_v8 = vld [vmem:[#allocation5 + $0xe8] sm:$0xf0]  ;;  %v1266_v31 = vld [vmem:[#allocation5 + $0x44] sm:$0xf0]  ;;  %v1195_v32 = vld [vmem:[#allocation5 + $0xc0] sm:$0xf] }
  0x2e   :  { %416 = vmatpush.bf16.msra.mxu2 %v980_v15  ;;  %429 = vmatpush.bf16.msra.mxu3 %v1044_v19  ;;  %v1203_v15 = vld [vmem:[#allocation5 + $0xd0] sm:$0xf]  ;;  %v1216_v16 = vor.u32 %v1285_v7, %v1213_v8  ;;  %v1267_v19 = vld [vmem:[#allocation5 + $0x54] sm:$0xf]  ;;  %v1133_v43 = vld [vmem:[#allocation5 + $0x48] sm:$0xf0] }
  0x2f   :  { %v1204_v27 = vor.u32 %v1284_v18, %v1203_v15  ;;  %v1281_v44 = vld [vmem:[#allocation5 + $0xc4] sm:$0xf]  ;;  %v1123_v56 = vld [vmem:[#allocation5 + $0x30] sm:$0xf]  ;;  %v1280_v61 = vld [vmem:[#allocation5 + $0xb4] sm:$0xf0] }
  0x30   :  { %v1187_v60 = vld [vmem:[#allocation5 + $0xb0] sm:$0xf]  ;;  %v1279_v2 = vld [vmem:[#allocation5 + $0xb4] sm:$0xf]  ;;  %v1189_v3 = vld [vmem:[#allocation5 + $0xb8] sm:$0xf0] }
  0x31   :  { %442 = vmatpush.bf16.msrb.mxu0 %v984_v20  ;;  %455 = vmatpush.bf16.msrb.mxu1 %v1048_v24  ;;  %v1141_v20 = vld [vmem:[#allocation5 + $0x58] sm:$0xf0]  ;;  %v1115_v7 = vld [vmem:[#allocation5 + $0x20] sm:$0xf]  ;;  %v1262_v8 = vld [vmem:[#allocation5 + $0x24] sm:$0xf0] }
  0x32   :  { %417 = vmatpush.bf16.msra.mxu2 %v972_v28  ;;  %430 = vmatpush.bf16.msra.mxu3 %v1036_v29  ;;  %v1144_v28 = vor.u32 %v1267_v19, %v1141_v20  ;;  %v1208_v29 = vor.u32 %v1283_v25, %v1205_v26  ;;  %v1261_v14 = vld [vmem:[#allocation5 + $0x24] sm:$0xf]  ;;  %v1117_v15 = vld [vmem:[#allocation5 + $0x28] sm:$0xf0]  ;;  %v1107_v19 = vld [vmem:[#allocation5 + $0x10] sm:$0xf] }
  0x33   :  { %v1181_v18 = vld [vmem:[#allocation5 + $0xa8] sm:$0xf0]  ;;  %v1260_v20 = vld [vmem:[#allocation5 + $0x14] sm:$0xf0]  ;;  %v1109_v26 = vld [vmem:[#allocation5 + $0x18] sm:$0xf0] }
  0x34   :  { %v1108_v25 = vor.u32 %v1260_v20, %v1107_v19  ;;  %s954_s14 = sshll.u32 %s1558_s5, 4  ;;  %s955_s14 = int_to_ptr.hbm [resolvable:$true] %s954_s14 }
  0x35   :  { %443 = vmatpush.bf16.msrb.mxu0 %v976_v35  ;;  %456 = vmatpush.bf16.msrb.mxu1 %v1040_v45  ;;  %v1197_v45 = vld [vmem:[#allocation5 + $0xc8] sm:$0xf0] }
  0x36   :  { %654 = vmatpush.bf16.msrb.mxu2 %v1156_v46  ;;  %667 = vmatpush.bf16.msrb.mxu3 %v1220_v47 }
  0x39   :  { %680 = vmatpush.bf16.msra.mxu0 %v1160_v57  ;;  %693 = vmatpush.bf16.msra.mxu1 %v1224_v58  ;;  %v1264_v57 = vld [vmem:[#allocation5 + $0x34] sm:$0xf0] }
  0x3a   :  { %655 = vmatpush.bf16.msrb.mxu2 %v1148_v4  ;;  %668 = vmatpush.bf16.msrb.mxu3 %v1212_v5  ;;  %v1124_v59 = vor.u32 %v1264_v57, %v1123_v56  ;;  %v181_v57 = vld [vmem:[#allocation7] ss:$8 sm:$0xf] }
  0x3d   :  { %681 = vmatpush.bf16.msra.mxu0 %v1152_v6  ;;  %694 = vmatpush.bf16.msra.mxu1 %v1216_v16  ;;  %v1192_v6 = vor.u32 %v1279_v2, %v1189_v3  ;;  %v1277_v16 = vld [vmem:[#allocation5 + $0xa4] sm:$0xf]  ;;  %v184_v2 = vperm.slane %v181_v57, 1 }
  0x3e   :  { %656 = vmatpush.bf16.msrb.mxu2 %v1140_v17  ;;  %669 = vmatpush.bf16.msrb.mxu3 %v1204_v27  ;;  %v1120_v17 = vor.u32 %v1261_v14, %v1117_v15  ;;  %v1275_v27 = vld [vmem:[#allocation5 + $0x94] sm:$0xf]  ;;  %v185_v14 = vperm.slane %v181_v57, 2  ;;  %v186_v15 = vperm.slane %v181_v57, 3 }
  0x41   :  { %682 = vmatpush.bf16.msra.mxu0 %v1144_v28  ;;  %695 = vmatpush.bf16.msra.mxu1 %v1208_v29  ;;  %v1173_v28 = vld [vmem:[#allocation5 + $0x98] sm:$0xf0] }
  0x95   :  { %v1462_v33 = vpop.f32.mrf.mxu0  ;;  %v1464_v34 = vpop.f32.mrf.mxu1 }
  0x96   :  { %v121_v39 = vrot.slane %v1462_v33, 4  ;;  %v135_v40 = vmul.f32 %v1462_v33, %v1462_v33  ;;  %v127_v41 = vrot.slane %v1464_v34, 4  ;;  %v136_v42 = vmul.f32 %v1464_v34, %v1464_v34 }
  0x98   :  { %v122_v51 = vadd.f32 %v121_v39, %v1462_v33  ;;  %v137_v52 = vrot.slane %v135_v40, 4  ;;  %v128_v53 = vadd.f32 %v127_v41, %v1464_v34  ;;  %v143_v54 = vrot.slane %v136_v42, 4  ;;  %v1282_v39 = vld [vmem:[#allocation5 + $0xc4] sm:$0xf0] }
  0x99   :  { %v1132_v41 = vor.u32 %v1266_v31, %v1131_v30  ;;  %v1099_v30 = vld [vmem:[#allocation5] sm:$0xf]  ;;  %v1258_v31 = vld [vmem:[#allocation5 + $0x4] sm:$0xf0] }
  0x9a   :  { %v123_v62 = vrot.slane %v122_v51, 2  ;;  %v138_v63 = vadd.f32 %v137_v52, %v135_v40  ;;  %v129_v0 = vrot.slane %v128_v53, 2  ;;  %v144_v1 = vadd.f32 %v143_v54, %v136_v42  ;;  %v1265_v40 = vld [vmem:[#allocation5 + $0x44] sm:$0xf] }
  0x9b   :  { %v1196_v42 = vor.u32 %v1282_v39, %v1195_v32  ;;  %v1136_v50 = vor.u32 %v1265_v40, %v1133_v43  ;;  %657 = vmatpush.bf16.msrb.mxu2 %v1132_v41  ;;  %v1101_v40 = vld [vmem:[#allocation5 + $0x8] sm:$0xf0]  ;;  %v1273_v41 = vld [vmem:[#allocation5 + $0x84] sm:$0xf] }
  0x9c   :  { %v124_v10 = vadd.f32 %v123_v62, %v122_v51  ;;  %v139_v11 = vrot.slane %v138_v63, 2  ;;  %v130_v12 = vadd.f32 %v129_v0, %v128_v53  ;;  %v145_v13 = vrot.slane %v144_v1, 2  ;;  %v1263_v62 = vld [vmem:[#allocation5 + $0x34] sm:$0xf] }
  0x9d   :  { %v1200_v51 = vor.u32 %v1281_v44, %v1197_v45  ;;  %670 = vmatpush.bf16.msrb.mxu3 %v1196_v42  ;;  %683 = vmatpush.bf16.msra.mxu0 %v1136_v50  ;;  %v1188_v0 = vor.u32 %v1280_v61, %v1187_v60  ;;  %v1165_v42 = vld [vmem:[#allocation5 + $0x88] sm:$0xf0]  ;;  %v1100_v45 = vor.u32 %v1258_v31, %v1099_v30  ;;  %v196_v60 = vld [vmem:[#allocation7 + $0x1] ss:$8 sm:$0xf] }
  0x9e   :  { %v125_v21 = vrot.slane %v124_v10, 1  ;;  %v140_v22 = vadd.f32 %v139_v11, %v138_v63  ;;  %v131_v23 = vrot.slane %v130_v12, 1  ;;  %v146_v24 = vadd.f32 %v145_v13, %v144_v1  ;;  %v1125_v1 = vld [vmem:[#allocation5 + $0x38] sm:$0xf0]  ;;  %v1179_v11 = vld [vmem:[#allocation5 + $0xa0] sm:$0xf] }
  0x9f   :  { %696 = vmatpush.bf16.msra.mxu1 %v1200_v51  ;;  %v1128_v5 = vor.u32 %v1263_v62, %v1125_v1  ;;  %658 = vmatpush.bf16.msrb.mxu2 %v1124_v59  ;;  %v183_v62 = vperm.slane %v181_v57, 0 }
  0xa0   :  { %v126_v35 = vadd.f32 %v125_v21, %v124_v10  ;;  %v141_v36 = vrot.slane %v140_v22, 1  ;;  %v132_v37 = vadd.f32 %v131_v23, %v130_v12  ;;  %v147_v38 = vrot.slane %v146_v24, 1  ;;  %v1278_v12 = vld [vmem:[#allocation5 + $0xa4] sm:$0xf0]  ;;  %v1276_v23 = vld [vmem:[#allocation5 + $0x94] sm:$0xf0] }
  0xa1   :  { %v1116_v10 = vor.u32 %v1262_v8, %v1115_v7  ;;  %671 = vmatpush.bf16.msrb.mxu3 %v1188_v0  ;;  %v1180_v13 = vor.u32 %v1278_v12, %v1179_v11  ;;  %684 = vmatpush.bf16.msra.mxu0 %v1128_v5  ;;  %v1184_v21 = vor.u32 %v1277_v16, %v1181_v18  ;;  %v198_v5 = vperm.slane %v196_v60, 0 }
  0xa2   :  { %v1474_v46 = vmul.f32 0.125, %v126_v35  ;;  %v142_v47 = vadd.f32 %v141_v36, %v140_v22  ;;  %v1476_v48 = vmul.f32 0.125, %v132_v37  ;;  %v148_v49 = vadd.f32 %v147_v38, %v146_v24  ;;  %v1171_v22 = vld [vmem:[#allocation5 + $0x90] sm:$0xf]  ;;  %v1259_v24 = vld [vmem:[#allocation5 + $0x14] sm:$0xf] }
  0xa3   :  { %697 = vmatpush.bf16.msra.mxu1 %v1192_v6  ;;  %659 = vmatpush.bf16.msrb.mxu2 %v1116_v10  ;;  %v1172_v29 = vor.u32 %v1276_v23, %v1171_v22  ;;  %v1112_v32 = vor.u32 %v1259_v24, %v1109_v26  ;;  %v1176_v35 = vor.u32 %v1275_v27, %v1173_v28  ;;  %v1163_v36 = vld [vmem:[#allocation5 + $0x80] sm:$0xf]  ;;  %v1274_v37 = vld [vmem:[#allocation5 + $0x84] sm:$0xf0]  ;;  %v1257_v38 = vld [vmem:[#allocation5 + $0x4] sm:$0xf] }
  0xa4   :  { %v149_v52 = vmul.f32 0.125, %v142_v47  ;;  %v153_v53 = vmul.f32 %v1474_v46, %v1474_v46  ;;  %v150_v54 = vmul.f32 0.125, %v148_v49  ;;  %v154_v55 = vmul.f32 %v1476_v48, %v1476_v48 }
  0xa5   :  { %672 = vmatpush.bf16.msrb.mxu3 %v1180_v13  ;;  %685 = vmatpush.bf16.msra.mxu0 %v1120_v17  ;;  %v1164_v49 = vor.u32 %v1274_v37, %v1163_v36  ;;  %v1104_v51 = vor.u32 %v1257_v38, %v1101_v40  ;;  %v151_v61 = vsub.f32 %v1462_v33, %v1474_v46  ;;  %v201_v17 = vperm.slane %v196_v60, 3 }
  0xa6   :  { %v155_v58 = vsub.f32 %v149_v52, %v153_v53  ;;  %v156_v63 = vsub.f32 %v150_v54, %v154_v55  ;;  %v1168_v52 = vor.u32 %v1273_v41, %v1165_v42  ;;  %v152_v0 = vsub.f32 %v1464_v34, %v1476_v48 }
  0xa7   :  { %698 = vmatpush.bf16.msra.mxu1 %v1184_v21  ;;  %660 = vmatpush.bf16.msrb.mxu2 %v1108_v25  ;;  %v200_v48 = vperm.slane %v196_v60, 2 }
  0xa8   :  { %v1482_v4 = vadd.f32 1e-05, %v155_v58  ;;  %v1484_v9 = vadd.f32 1e-05, %v156_v63 }
  0xa9   :  { %673 = vmatpush.bf16.msrb.mxu3 %v1172_v29  ;;  %686 = vmatpush.bf16.msra.mxu0 %v1112_v32 }
  0xaa   :  { %1297 = vrsqrt.f32 %v1482_v4  ;;  %vm165_vm4 = vweird.f32 %v1482_v4  ;;  %vm175_vm6 = vweird.f32 %v1484_v9 }
  0xab   :  { %1299 = vrsqrt.f32 %v1484_v9  ;;  %699 = vmatpush.bf16.msra.mxu1 %v1176_v35  ;;  %661 = vmatpush.bf16.msrb.mxu2 %v1100_v45 }
  0xad   :  { %674 = vmatpush.bf16.msrb.mxu3 %v1164_v49  ;;  %687 = vmatpush.bf16.msra.mxu0 %v1104_v51 }
  0xaf   :  { %700 = vmatpush.bf16.msra.mxu1 %v1168_v52 }
  0xb0   :  { %v1298_v39 = vpop.eup %1297 }
  0xb1   :  { %v1300_v43 = vpop.eup %1299  ;;  %v160_v44 = vmul.f32 %v1298_v39, %v1482_v4  ;;  %vm166_vm2 = vweird.f32 %v1298_v39  ;;  %v199_v4 = vperm.slane %v196_v60, 1 }
  0xb2   :  { %v170_v47 = vmul.f32 %v1300_v43, %v1484_v9  ;;  %vm176_vm3 = vweird.f32 %v1300_v43  ;;  %vm167_vm5 = vmor %vm165_vm4, %vm166_vm2 }
  0xb3   :  { %v161_v50 = vmul.f32 %v1298_v39, %v160_v44  ;;  %vm177_vm7 = vmor %vm175_vm6, %vm176_vm3  ;;  %vm921_vm6 = vcmask 7168  }
  0xb4   :  { %v171_v53 = vmul.f32 %v1300_v43, %v170_v47 }
  0xb5   :  { %v162_v54 = vmul.f32 0.5, %v161_v50 }
  0xb6   :  { %v172_v55 = vmul.f32 0.5, %v171_v53 }
  0xb7   :  { %v163_v56 = vsub.f32 1.5, %v162_v54 }
  0xb8   :  { %v173_v58 = vsub.f32 1.5, %v172_v55 }
  0xb9   :  { %v164_v59 = vmul.f32 %v1298_v39, %v163_v56 }
  0xba   :  { %v174_v63 = vmul.f32 %v1300_v43, %v173_v58 }
  0xbb   :  { %v168_v1 = vsel %vm167_vm5, %v1298_v39, %v164_v59 }
  0xbc   :  { %v179_v3 = vmul.f32 %v168_v1, %v151_v61  ;;  %v178_v6 = vsel %vm177_vm7, %v1300_v43, %v174_v63 }
  0xbd   :  { %v180_v7 = vmul.f32 %v178_v6, %v152_v0 }
  0xbe   :  { %v191_v8 = vmul.f32 %v183_v62, %v179_v3  ;;  %v193_v34 = vmul.f32 %v185_v14, %v179_v3 }
  0xbf   :  { %v192_v10 = vmul.f32 %v184_v2, %v180_v7  ;;  %v194_v16 = vmul.f32 %v186_v15, %v180_v7 }
  0xc0   :  { %v206_v11 = vadd.f32 %v198_v5, %v191_v8  ;;  %v208_v18 = vadd.f32 %v200_v48, %v193_v34 }
  0xc1   :  { %v207_v33 = vadd.f32 %v199_v4, %v192_v10  ;;  %v209_v19 = vadd.f32 %v201_v17, %v194_v16 }
  0xc2   :  { %v210_v46 = vmax.f32 %v206_v11, 0.0  ;;  %v212_v20 = vmax.f32 %v208_v18, 0.0 }
  0xc3   :  { %v211_v12 = vmax.f32 %v207_v33, 0.0  ;;  %v213_v21 = vmax.f32 %v209_v19, 0.0 }
  0xc4   :  { %v214_v13 = vpack.c.bf16 %v210_v46, %v210_v46  ;;  %v216_v22 = vpack.c.bf16 %v212_v20, %v212_v20 }
  0xc5   :  { %v215_v9 = vpack.c.bf16 %v211_v12, %v211_v12  ;;  %v217_v23 = vpack.c.bf16 %v213_v21, %v213_v21 }
  0xc6   :  { %418 = vmatmul.bf16.vlgmr.msra.gmra.mxu2 %v214_v13  ;;  %444 = vmatmul.bf16.vlgmr.msrb.gmra.mxu0 %v214_v13 }
  0xc7   :  { %431 = vmatmul.bf16.vlgmr.msra.gmra.mxu3 %v215_v9  ;;  %457 = vmatmul.bf16.vlgmr.msrb.gmra.mxu1 %v215_v9 }
  0xd6   :  { %662 = vmatmul.bf16.vlgmr.msrb.gmra.mxu2 %v216_v22  ;;  %688 = vmatmul.bf16.vlgmr.msra.gmra.mxu0 %v216_v22 }
  0xd7   :  { %675 = vmatmul.bf16.vlgmr.msrb.gmra.mxu3 %v217_v23  ;;  %701 = vmatmul.bf16.vlgmr.msra.gmra.mxu1 %v217_v23 }
 0x143   :  { %v445_v24 = vpop.f32.mrf.mxu0 }
 0x144   :  { %v458_v25 = vpop.f32.mrf.mxu1 }
 0x145   :  { %v1496_v26 = vadd.f32 %v458_v25, %v445_v24 }
 0x147   :  { %v712_v27 = vrot.slane %v1496_v26, 4  ;;  %v735_v28 = vmul.f32 %v1496_v26, %v1496_v26 }
 0x149   :  { %v713_v29 = vadd.f32 %v712_v27, %v1496_v26  ;;  %v744_v30 = vrot.slane %v735_v28, 4  ;;  %v419_v31 = vpop.f32.mrf.mxu2 }
 0x14a   :  { %v432_v32 = vpop.f32.mrf.mxu3 }
 0x14b   :  { %v714_v35 = vrot.slane %v713_v29, 2  ;;  %v745_v36 = vadd.f32 %v744_v30, %v735_v28  ;;  %v1502_v37 = vadd.f32 %v432_v32, %v419_v31  ;;  %v447_v38 = vpop.f32.mrf.mxu0 }
 0x14c   :  { %v460_v39 = vpop.f32.mrf.mxu1 }
 0x14d   :  { %v715_v40 = vadd.f32 %v714_v35, %v713_v29  ;;  %v746_v41 = vrot.slane %v745_v36, 2  ;;  %v706_v42 = vrot.slane %v1502_v37, 4  ;;  %v734_v43 = vmul.f32 %v1502_v37, %v1502_v37 }
 0x14f   :  { %v716_v44 = vrot.slane %v715_v40, 1  ;;  %v747_v45 = vadd.f32 %v746_v41, %v745_v36  ;;  %v707_v47 = vadd.f32 %v706_v42, %v1502_v37  ;;  %v738_v49 = vrot.slane %v734_v43, 4 }
 0x151   :  { %v717_v50 = vadd.f32 %v716_v44, %v715_v40  ;;  %v748_v51 = vrot.slane %v747_v45, 1  ;;  %v708_v52 = vrot.slane %v707_v47, 2  ;;  %v421_v53 = vpop.f32.mrf.mxu2  ;;  %v739_v54 = vadd.f32 %v738_v49, %v734_v43 }
 0x152   :  { %v434_v55 = vpop.f32.mrf.mxu3 }
 0x153   :  { %v1508_v56 = vmul.f32 0.125, %v717_v50  ;;  %v749_v57 = vadd.f32 %v748_v51, %v747_v45  ;;  %v709_v58 = vadd.f32 %v708_v52, %v707_v47  ;;  %v689_v59 = vpop.f32.mrf.mxu0  ;;  %v740_v60 = vrot.slane %v739_v54, 2 }
 0x154   :  { %v702_v61 = vpop.f32.mrf.mxu1 }
 0x155   :  { %v763_v62 = vmul.f32 0.125, %v749_v57  ;;  %v771_v63 = vmul.f32 %v1508_v56, %v1508_v56  ;;  %v710_v0 = vrot.slane %v709_v58, 1  ;;  %v741_v1 = vadd.f32 %v740_v60, %v739_v54 }
 0x156   :  { %v1512_v2 = vadd.f32 %v702_v61, %v689_v59  ;;  %v1532_v59 = vld [vmem:[#allocation7 + $0x2] ss:$8 sm:$0xf]  ;;  %v767_v61 = vsub.f32 %v1496_v26, %v1508_v56 }
 0x157   :  { %v775_v3 = vsub.f32 %v763_v62, %v771_v63  ;;  %v711_v5 = vadd.f32 %v710_v0, %v709_v58  ;;  %v742_v6 = vrot.slane %v741_v1, 1 }
 0x158   :  { %v724_v7 = vrot.slane %v1512_v2, 4  ;;  %v737_v4 = vmul.f32 %v1512_v2, %v1512_v2 }
 0x159   :  { %v779_v8 = vadd.f32 1e-05, %v775_v3  ;;  %v1517_v10 = vmul.f32 0.125, %v711_v5  ;;  %v663_v11 = vpop.f32.mrf.mxu2  ;;  %v743_v33 = vadd.f32 %v742_v6, %v741_v1  ;;  %v830_v6 = vperm.slane %v1532_v59, 1 }
 0x15a   :  { %v725_v46 = vadd.f32 %v724_v7, %v1512_v2  ;;  %v756_v12 = vrot.slane %v737_v4, 4  ;;  %v676_v13 = vpop.f32.mrf.mxu3 }
 0x15b   :  { %1301 = vrsqrt.f32 %v779_v8  ;;  %v770_v14 = vmul.f32 %v1517_v10, %v1517_v10  ;;  %v691_v9 = vpop.f32.mrf.mxu0  ;;  %v762_v15 = vmul.f32 0.125, %v743_v33  ;;  %v1522_v16 = vadd.f32 %v676_v13, %v663_v11  ;;  %v842_v11 = vld [vmem:[#allocation7 + $0x3] ss:$8 sm:$0xf] }
 0x15c   :  { %v726_v34 = vrot.slane %v725_v46, 2  ;;  %v757_v48 = vadd.f32 %v756_v12, %v737_v4  ;;  %v704_v17 = vpop.f32.mrf.mxu1  ;;  %vm798_vm9 = vweird.f32 %v779_v8  ;;  %v845_v12 = vperm.slane %v842_v11, 1 }
 0x15d   :  { %v774_v18 = vsub.f32 %v762_v15, %v770_v14  ;;  %v718_v21 = vrot.slane %v1522_v16, 4  ;;  %v736_v22 = vmul.f32 %v1522_v16, %v1522_v16  ;;  %v766_v13 = vsub.f32 %v1502_v37, %v1517_v10 }
 0x15e   :  { %v727_v19 = vadd.f32 %v726_v34, %v725_v46  ;;  %v758_v20 = vrot.slane %v757_v48, 2  ;;  %v829_v14 = vperm.slane %v1532_v59, 0 }
 0x15f   :  { %v778_v23 = vadd.f32 1e-05, %v774_v18  ;;  %v719_v27 = vadd.f32 %v718_v21, %v1522_v16  ;;  %v750_v29 = vrot.slane %v736_v22, 4  ;;  %v844_v18 = vperm.slane %v842_v11, 0 }
 0x160   :  { %v728_v24 = vrot.slane %v727_v19, 1  ;;  %v759_v25 = vadd.f32 %v758_v20, %v757_v48 }
 0x161   :  { %v1302_v28 = vpop.eup %1301  ;;  %v665_v30 = vpop.f32.mrf.mxu2  ;;  %1303 = vrsqrt.f32 %v778_v23  ;;  %v720_v38 = vrot.slane %v719_v27, 2  ;;  %v751_v39 = vadd.f32 %v750_v29, %v736_v22  ;;  %vm788_vm12 = vweird.f32 %v778_v23  ;;  %v901_v22 = vld [vmem:[#allocation7 + $0x6] ss:$8 sm:$0xf] }
 0x162   :  { %v793_v31 = vmul.f32 %v1302_v28, %v779_v8  ;;  %v678_v32 = vpop.f32.mrf.mxu3  ;;  %v729_v35 = vadd.f32 %v728_v24, %v727_v19  ;;  %v760_v36 = vrot.slane %v759_v25, 1  ;;  %vm799_vm8 = vweird.f32 %v1302_v28 }
 0x163   :  { %v721_v43 = vadd.f32 %v720_v38, %v719_v27  ;;  %v752_v44 = vrot.slane %v751_v39, 2  ;;  %vm800_vm10 = vmor %vm798_vm9, %vm799_vm8  ;;  %v903_v27 = vperm.slane %v901_v22, 0 }
 0x164   :  { %v794_v40 = vmul.f32 %v1302_v28, %v793_v31  ;;  %v1528_v41 = vmul.f32 0.125, %v729_v35  ;;  %v761_v42 = vadd.f32 %v760_v36, %v759_v25 }
 0x165   :  { %v722_v50 = vrot.slane %v721_v43, 1  ;;  %v753_v53 = vadd.f32 %v752_v44, %v751_v39  ;;  %v832_v44 = vperm.slane %v1532_v59, 3 }
 0x166   :  { %v795_v45 = vmul.f32 0.5, %v794_v40  ;;  %v765_v47 = vmul.f32 0.125, %v761_v42  ;;  %v773_v49 = vmul.f32 %v1528_v41, %v1528_v41  ;;  %v769_v38 = vsub.f32 %v1512_v2, %v1528_v41  ;;  %v861_v2 = vld [vmem:[#allocation7 + $0x4] ss:$8 sm:$0xf] }
 0x167   :  { %v1304_v51 = vpop.eup %1303  ;;  %v723_v57 = vadd.f32 %v722_v50, %v721_v43  ;;  %v754_v60 = vrot.slane %v753_v53, 1  ;;  %v831_v50 = vperm.slane %v1532_v59, 2 }
 0x168   :  { %v796_v52 = vsub.f32 1.5, %v795_v45  ;;  %v783_v54 = vmul.f32 %v1304_v51, %v778_v23  ;;  %v777_v55 = vsub.f32 %v765_v47, %v773_v49  ;;  %vm789_vm11 = vweird.f32 %v1304_v51 }
 0x169   :  { %v1536_v0 = vmul.f32 0.125, %v723_v57  ;;  %v755_v3 = vadd.f32 %v754_v60, %v753_v53  ;;  %vm790_vm13 = vmor %vm788_vm12, %vm789_vm11  ;;  %v864_v60 = vperm.slane %v861_v2, 1 }
 0x16a   :  { %v797_v58 = vmul.f32 %v1302_v28, %v796_v52  ;;  %v784_v62 = vmul.f32 %v1304_v51, %v783_v54  ;;  %v781_v63 = vadd.f32 1e-05, %v777_v55  ;;  %v847_v52 = vperm.slane %v842_v11, 3 }
 0x16b   :  { %v764_v4 = vmul.f32 0.125, %v755_v3  ;;  %v772_v8 = vmul.f32 %v1536_v0, %v1536_v0  ;;  %v768_v49 = vsub.f32 %v1522_v16, %v1536_v0  ;;  %v846_v54 = vperm.slane %v842_v11, 2 }
 0x16c   :  { %v801_v1 = vsel %vm800_vm10, %v1302_v28, %v797_v58  ;;  %v785_v7 = vmul.f32 0.5, %v784_v62  ;;  %1305 = vrsqrt.f32 %v781_v63  ;;  %v904_v28 = vperm.slane %v901_v22, 1 }
 0x16d   :  { %v823_v5 = vmul.f32 %v801_v1, %v767_v61  ;;  %v776_v26 = vsub.f32 %v764_v4, %v772_v8  ;;  %vm818_vm15 = vweird.f32 %v781_v63  ;;  %v863_v55 = vperm.slane %v861_v2, 0  ;;  %v881_v1 = vld [vmem:[#allocation7 + $0x5] ss:$8 sm:$0xf] }
 0x16e   :  { %v786_v33 = vsub.f32 1.5, %v785_v7  ;;  %v865_v62 = vperm.slane %v861_v2, 2  ;;  %v905_v3 = vperm.slane %v901_v22, 2  ;;  %v883_v16 = vperm.slane %v881_v1, 0 }
 0x16f   :  { %v838_v56 = vmul.f32 %v830_v6, %v823_v5  ;;  %v780_v9 = vadd.f32 1e-05, %v776_v26  ;;  %v866_v5 = vperm.slane %v861_v2, 3  ;;  %v906_v7 = vperm.slane %v901_v22, 3 }
 0x170   :  { %v787_v46 = vmul.f32 %v1304_v51, %v786_v33  ;;  %v884_v4 = vperm.slane %v881_v1, 1  ;;  %v885_v26 = vperm.slane %v881_v1, 2  ;;  %v934_v22 = vlaneseq }
 0x171   :  { %1307 = vrsqrt.f32 %v780_v9  ;;  %v853_v19 = vadd.f32 %v845_v12, %v838_v56  ;;  %vm808_vm2 = vweird.f32 %v780_v9 }
 0x172   :  { %v1306_v15 = vpop.eup %1305  ;;  %v791_v34 = vsel %vm790_vm13, %v1304_v51, %v787_v46 }
 0x173   :  { %v822_v48 = vmul.f32 %v791_v34, %v766_v13  ;;  %v813_v17 = vmul.f32 %v1306_v15, %v781_v63  ;;  %v857_v25 = vmax.f32 %v853_v19, 0.0  ;;  %vm819_vm14 = vweird.f32 %v1306_v15 }
 0x174   :  { %vm820_vm0 = vmor %vm818_vm15, %vm819_vm14 }
 0x175   :  { %v837_v20 = vmul.f32 %v829_v14, %v822_v48  ;;  %v814_v21 = vmul.f32 %v1306_v15, %v813_v17  ;;  %v912_v36 = vmul.f32 %v904_v28, %v857_v25  ;;  %v872_v59 = vmul.f32 %v864_v60, %v857_v25 }
 0x176   :  { %v886_v17 = vperm.slane %v881_v1, 3 }
 0x177   :  { %v815_v24 = vmul.f32 0.5, %v814_v21  ;;  %v852_v23 = vadd.f32 %v844_v18, %v837_v20  ;;  %v1308_v37 = vpop.eup %1307 }
 0x178   :  { %v803_v30 = vmul.f32 %v1308_v37, %v780_v9  ;;  %vm809_vm1 = vweird.f32 %v1308_v37 }
 0x179   :  { %v816_v10 = vsub.f32 1.5, %v815_v24  ;;  %v856_v29 = vmax.f32 %v852_v23, 0.0  ;;  %vm810_vm3 = vmor %vm808_vm2, %vm809_vm1  ;;  %v935_v23 = vand.u32 127, %v934_v22 }
 0x17a   :  { %v804_v32 = vmul.f32 %v1308_v37, %v803_v30 }
 0x17b   :  { %v817_v31 = vmul.f32 %v1306_v15, %v816_v10  ;;  %v911_v35 = vmul.f32 %v903_v27, %v856_v29  ;;  %v871_v63 = vmul.f32 %v863_v55, %v856_v29  ;;  %v891_v56 = vmul.f32 %v883_v16, %v856_v29 }
 0x17c   :  { %v805_v40 = vmul.f32 0.5, %v804_v32  ;;  %vm936_vm4 = vcmp.eq.s32.totalorder %v935_v23, 0  ;;  %vm938_vm5 = vcmp.eq.s32.totalorder %v935_v23, 1  ;;  %vm941_vm7 = vcmp.lt.s32.totalorder %v935_v23, 2 }
 0x17d   :  { %v821_v39 = vsel %vm820_vm0, %v1306_v15, %v817_v31  ;;  %v915_v42 = vadd.f32 %v912_v36, %v911_v35  ;;  %v875_v33 = vadd.f32 %v872_v59, %v871_v63  ;;  %v892_v15 = vmul.f32 %v884_v4, %v857_v25 }
 0x17e   :  { %v825_v43 = vmul.f32 %v821_v39, %v769_v38  ;;  %v806_v45 = vsub.f32 1.5, %v805_v40 }
 0x17f   :  { %v895_v18 = vadd.f32 %v892_v15, %v891_v56 }
 0x180   :  { %v807_v47 = vmul.f32 %v1308_v37, %v806_v45  ;;  %v840_v51 = vmul.f32 %v832_v44, %v825_v43  ;;  %v940_v44 = vld [vmem:[#allocation7 + $0x7] ss:$0 sm:$0xff] }
 0x182   :  { %v811_v53 = vsel %vm810_vm3, %v1308_v37, %v807_v47  ;;  %v855_v58 = vadd.f32 %v847_v52, %v840_v51 }
 0x183   :  { %v824_v41 = vmul.f32 %v811_v53, %v768_v49 }
 0x184   :  { %v859_v6 = vmax.f32 %v855_v58, 0.0 }
 0x185   :  { %v839_v57 = vmul.f32 %v831_v50, %v824_v41 }
 0x186   :  { %v874_v46 = vmul.f32 %v866_v5, %v859_v6  ;;  %v914_v13 = vmul.f32 %v906_v7, %v859_v6  ;;  %v894_v20 = vmul.f32 %v886_v17, %v859_v6 }
 0x187   :  { %v854_v61 = vadd.f32 %v846_v54, %v839_v57 }
 0x189   :  { %v858_v0 = vmax.f32 %v854_v61, 0.0 }
 0x18b   :  { %v873_v8 = vmul.f32 %v865_v62, %v858_v0  ;;  %v913_v11 = vmul.f32 %v905_v3, %v858_v0  ;;  %v893_v34 = vmul.f32 %v885_v26, %v858_v0 }
 0x18d   :  { %v876_v12 = vadd.f32 %v875_v33, %v873_v8  ;;  %v916_v14 = vadd.f32 %v915_v42, %v913_v11  ;;  %v896_v19 = vadd.f32 %v895_v18, %v893_v34 }
 0x18f   :  { %v877_v9 = vadd.f32 %v876_v12, %v874_v46  ;;  %v917_v48 = vadd.f32 %v916_v14, %v914_v13  ;;  %v897_v21 = vadd.f32 %v896_v19, %v894_v20 }
 0x191   :  { %878 = vadd.xlane.f32.xlu0 %v877_v9 }
 0x199   :  { %898 = vadd.xlane.f32.xlu0 %v897_v21 }
 0x204   :  { %v879_v24 = vpop.xlane.xlu0 %878 }
 0x205   :  { %v937_v27 = vsel %vm936_vm4, %v879_v24, 0.0 }
 0x20c   :  { %v899_v28 = vpop.xlane.xlu0 %898 }
 0x20d   :  { %v920_v37 = vadd.f32 %v899_v28, %v879_v24  ;;  %v939_v10 = vsel %vm938_vm5, %v899_v28, %v937_v27 }
 0x20f   :  { %v922_v25 = vsel %vm921_vm6, %v920_v37, 0.0 }
 0x210   :  { %923 = vadd.xlane.f32.xlu1 %v922_v25 }
 0x218   :  { %918 = vadd.xlane.f32.xlu1 %v917_v48 }
 0x283   :  { %v924_v29 = vpop.xlane.xlu1 %923 }
 0x284   :  { %v925_v30 = vrot.slane %v924_v29, 4 }
 0x286   :  { %v926_v31 = vadd.f32 %v925_v30, %v924_v29 }
 0x288   :  { %v927_v32 = vrot.slane %v926_v31, 2 }
 0x28a   :  { %v928_v35 = vadd.f32 %v927_v32, %v926_v31 }
 0x28b   :  { %v919_v39 = vpop.xlane.xlu1 %918 }
 0x28c   :  { %v929_v36 = vrot.slane %v928_v35, 1  ;;  %v942_v42 = vadd.f32 %v939_v10, %v919_v39 }
 0x28e   :  { %v930_v38 = vadd.f32 %v929_v36, %v928_v35 }
 0x290   :  { %1289 = vpush %v930_v38 }
 0x2c1   :  { %s1290_s0 = spop %1289 }
 0x2c2   :  { %v932_v40 = vstv %s1290_s0 }
 0x2c3   :  { %v933_v43 = vmul.f32 0.0625, %v932_v40 }
 0x2c5   :  { %v943_v45 = vsub.f32 %v942_v42, %v933_v43 }
 0x2c7   :  { %v944_v47 = vadd.f32 %v943_v45, %v940_v44 }
 0x2c9   :  { %v945_v49 = vsel %vm941_vm7, %v944_v47, 0.0 }
 0x2ca   :  { %946 = vst [vmem:[#allocation8] sm:$0xff] %v945_v49 }
 0x2cb   :  { %957 = dma.vmem_to_hbm [thread:$0]  %s953_s4, 128, %s955_s14, [#allocation4]  }
 0x2cc   :  { %1409 = dma.done.wait [#allocation4], 128  }
 0x2cd   :  { %1410 = vsyncadd [#allocation4], 4294967168 }
 0x2ce   :  { %962 = vsyncpa [#allocation3], 1 }
 0x2cf   :  { %963 = vsyncpa [#allocation6], 1 }
 0x2d0   :  { %964 = vsyncpa [#allocation4], 1 }

</bundles_post_ra>
